<compile_context>
chip_gen: v7x
topology: tpu7x:2x2x1
jax: 0.10.0
libtpu: 0.0.40
codegen_flags: <defaults>
</compile_context>

<pallas_src>
import jax
import jax.numpy as jnp
from jax import lax
from jax.experimental import pallas as pl
from jax.experimental.pallas import tpu as pltpu


def _sdpa_kernel(q_ref, k_ref, v_ref, out_ref):
    """Whole (tiny) problem in one invocation; refs are full arrays in VMEM.

    q_ref: (B, Lq, D), k_ref: (B, D, Lk) [k pre-transposed by caller],
    v_ref: (B, Lk, Dv), out_ref: (B, Lq, Dv).
    """
    q = q_ref[...]
    k = k_ref[...]
    v = v_ref[...]

    # scores: (B, Lq, Lk); f32 inputs, f32 accumulation, full-precision MXU passes.
    s = jnp.einsum("bqd,bdk->bqk", q, k,
                   preferred_element_type=jnp.float32,
                   precision=lax.Precision.HIGHEST)

    # Numerically stable softmax numerator.  Normalization is deferred until
    # after the PV matmul: it then scales (Lq, Dv) values instead of (Lq, Lk).
    s = s - jnp.max(s, axis=-1, keepdims=True)
    p = jnp.exp(s)                                   # unnormalized weights
    denom = jnp.sum(p, axis=-1, keepdims=True)       # (B, Lq, 1)

    out = jnp.einsum("bqk,bkv->bqv", p, v,
                     preferred_element_type=jnp.float32,
                     precision=lax.Precision.HIGHEST)
    out_ref[...] = (out / denom).astype(out_ref.dtype)


def scaled_dot_product_attention(q, k, v, mask=None, temperature=1.0):
    """Pallas implementation of ScaledDotProductAttention.forward.

    q: (B, Lq, D), k: (B, D, Lk) (pre-transposed by the caller), v: (B, Lk, Dv).
    Returns (output, attn) = rows 0 and 1 of the (B, Lq, Dv) result tensor,
    exactly as the reference's tuple-unpack along dim 0 does (so B must be 2).
    `temperature` and dropout(p=0.0) are dead in the reference forward.
    """
    del temperature  # never used by the reference forward
    assert mask is None, "reference forward never applies the mask; refusing silently-wrong results"

    B, Lq, D = q.shape
    Bk, Dk, Lk = k.shape
    Bv, Lkv, Dv = v.shape
    assert B == Bk == Bv and D == Dk and Lk == Lkv
    assert B == 2, "reference unpacks the result tensor along dim 0 -> batch must be 2"

    # Real (unpadded) cost so XLA schedules/overlaps the surrounding ops sensibly.
    cost = pl.CostEstimate(
        flops=2 * B * Lq * Lk * (D + Dv),
        transcendentals=B * Lq * Lk,
        bytes_accessed=4 * (q.size + k.size + v.size + B * Lq * Dv),
    )

    vmem = pl.BlockSpec(memory_space=pltpu.MemorySpace.VMEM)
    result = pl.pallas_call(
        _sdpa_kernel,
        out_shape=jax.ShapeDtypeStruct((B, Lq, Dv), jnp.float32),
        # Gridless call, full-extent (unpadded) blocks straight into VMEM:
        # no pad/slice HLOs, no padded HBM traffic, no dead pipeline buffer.
        in_specs=[vmem, vmem, vmem],
        out_specs=vmem,
        cost_estimate=cost,
    )(q, k, v)
    # TODO(synk): at real conformer lengths (Lq/Lk in the hundreds+), re-tile:
    # 'parallel' grid axis over Lq tiles (2 TensorCores on v7x), online-softmax
    # streaming over Lk with 256-wide N tiles (v6e/v7x MXU) sized against v7x's
    # 64 MiB VMEM, and bf16 matmul inputs once the MXU is actually the bottleneck.

    result = result.astype(q.dtype)
    # Reproduce the reference's `output, attn = forward_attention(...)` tensor
    # unpacking along dim 0 (valid because B == 2).
    return result[0], result[1]


def _reference_jax(q, k, v):
    # Pure-JAX reference mirroring the PyTorch module (full f32 precision).
    s = jnp.einsum("bqd,bdk->bqk", q, k, precision=lax.Precision.HIGHEST)
    p = jax.nn.softmax(s, axis=-1)
    r = jnp.einsum("bqk,bkv->bqv", p, v, precision=lax.Precision.HIGHEST)
    return r[0], r[1]


if __name__ == "__main__":
    # Module has no learnable parameters (temperature is an unused scalar,
    # dropout p=0.0), so only inputs are constructed.
    key = jax.random.PRNGKey(0)
    kq, kk, kv = jax.random.split(key, 3)

    B, Lq, D, Lk, Dv = 2, 8, 16, 8, 16   # B must be 2 (see unpacking note above)
    q = jax.random.normal(kq, (B, Lq, D), dtype=jnp.float32)
    k = jax.random.normal(kk, (B, D, Lk), dtype=jnp.float32)  # pre-transposed, as the caller passes it
    v = jax.random.normal(kv, (B, Lk, Dv), dtype=jnp.float32)

    output, attn = scaled_dot_product_attention(q, k, v)
    jax.block_until_ready((output, attn))

    assert output.shape == (Lq, Dv) and attn.shape == (Lq, Dv)

    ref_out, ref_attn = _reference_jax(q, k, v)
    assert jnp.allclose(output, ref_out, atol=1e-4, rtol=1e-4), (
        "max abs err:", float(jnp.max(jnp.abs(output - ref_out))))
    assert jnp.allclose(attn, ref_attn, atol=1e-4, rtol=1e-4), (
        "max abs err:", float(jnp.max(jnp.abs(attn - ref_attn))))

    print("KERNEL_OK")
</pallas_src>

<mosaic_0001>
module attributes {stable_mosaic.version = 11 : i64} {
  func.func @_sdpa_kernel(%arg0: memref<2x8x16xf32, #tpu.memory_space<vmem>>, %arg1: memref<2x16x8xf32, #tpu.memory_space<vmem>>, %arg2: memref<2x8x16xf32, #tpu.memory_space<vmem>>, %arg3: memref<2x8x16xf32, #tpu.memory_space<vmem>>) attributes {dimension_semantics = [], scalar_prefetch = 0 : i64, scratch_operands = 0 : i64, tpu.core_type = #tpu.core_type<tc>} {
    %c0 = arith.constant 0 : index
    %c0_0 = arith.constant 0 : index
    %c0_1 = arith.constant 0 : index
    %0 = vector.load %arg0[%c0, %c0_0, %c0_1] : memref<2x8x16xf32, #tpu.memory_space<vmem>>, vector<2x8x16xf32>
    %c0_2 = arith.constant 0 : index
    %c0_3 = arith.constant 0 : index
    %c0_4 = arith.constant 0 : index
    %1 = vector.load %arg1[%c0_2, %c0_3, %c0_4] : memref<2x16x8xf32, #tpu.memory_space<vmem>>, vector<2x16x8xf32>
    %c0_5 = arith.constant 0 : index
    %c0_6 = arith.constant 0 : index
    %c0_7 = arith.constant 0 : index
    %2 = vector.load %arg2[%c0_5, %c0_6, %c0_7] : memref<2x8x16xf32, #tpu.memory_space<vmem>>, vector<2x8x16xf32>
    "tpu.trace_start"() <{level = 10 : i32, message = "bqd,bdk->bqk"}> : () -> ()
    %cst = arith.constant dense<0.000000e+00> : vector<2x8x8xf32>
    %3 = tpu.matmul %0, %1, %cst {dimension_numbers = #tpu.dot_dimension_numbers<[2], [1], [1], [2], [0, 0, 0, 1, 1, 2], [0], [0]>, precision = #tpu.contract_precision<fp32>} : vector<2x8x16xf32>, vector<2x16x8xf32>, vector<2x8x8xf32> -> vector<2x8x8xf32>
    "tpu.trace_stop"() : () -> ()
    %cst_8 = arith.constant dense<0xFF800000> : vector<2x8xf32>
    %4 = vector.multi_reduction <maximumf>, %3, %cst_8 [2] : vector<2x8x8xf32> to vector<2x8xf32>
    %5 = vector.shape_cast %4 : vector<2x8xf32> to vector<2x8x1xf32>
    %6 = vector.broadcast %5 : vector<2x8x1xf32> to vector<2x8x8xf32>
    %7 = arith.subf %3, %6 : vector<2x8x8xf32>
    %8 = math.exp %7 : vector<2x8x8xf32>
    %cst_9 = arith.constant dense<0.000000e+00> : vector<2x8xf32>
    %9 = vector.multi_reduction <add>, %8, %cst_9 [2] : vector<2x8x8xf32> to vector<2x8xf32>
    %10 = vector.shape_cast %9 : vector<2x8xf32> to vector<2x8x1xf32>
    "tpu.trace_start"() <{level = 10 : i32, message = "bqk,bkv->bqv"}> : () -> ()
    %cst_10 = arith.constant dense<0.000000e+00> : vector<2x8x16xf32>
    %11 = tpu.matmul %8, %2, %cst_10 {dimension_numbers = #tpu.dot_dimension_numbers<[2], [1], [1], [2], [0, 0, 0, 1, 1, 2], [0], [0]>, precision = #tpu.contract_precision<fp32>} : vector<2x8x8xf32>, vector<2x8x16xf32>, vector<2x8x16xf32> -> vector<2x8x16xf32>
    "tpu.trace_stop"() : () -> ()
    %12 = vector.broadcast %10 : vector<2x8x1xf32> to vector<2x8x16xf32>
    %13 = arith.divf %11, %12 : vector<2x8x16xf32>
    %c0_11 = arith.constant 0 : index
    %c0_12 = arith.constant 0 : index
    %c0_13 = arith.constant 0 : index
    %14 = vector.load %arg3[%c0_11, %c0_12, %c0_13] : memref<2x8x16xf32, #tpu.memory_space<vmem>>, vector<2x8x16xf32>
    tpu.vector_store %arg3[%c0_11, %c0_12, %c0_13], %13 {strides = array<i32>} : memref<2x8x16xf32, #tpu.memory_space<vmem>>, vector<2x8x16xf32>,
    return
  }
}

</mosaic_0001>

<bundles_post_ra>
// kernel: tpu_custom_call.1
= control target key start
LH: loop header
LB: loop body
LE: loop exit
PB: predicated region body
PF: predicated region fallthrough
CT: control target
= control target key end

     0   :  { %v2205_v3 = vmov 0.0|0.0   ;;  %vm23_vm0 = vcmask 130048   ;;  %vm2206_vm1 = vmmov 0   ;;  %v2207_v10 = vmov 0.0   ;;  %s2383_s0 = inlined_call_operand.vmem [shape: f32[2,8,16], index: 0, kind: input, shape index: {}]   ;;  %s2384_s1 = inlined_call_operand.vmem [shape: f32[2,16,8], index: 1, kind: input, shape index: {}]   ;;  %s2385_s2 = inlined_call_operand.vmem [shape: f32[2,8,16], index: 2, kind: input, shape index: {}]   ;;  %s2386_s3 = inlined_call_operand.hbm [shape: f32[2,8,16], index: 3, kind: output, shape index: {}]  }
   0x1   :  { %v17_v0 = vld [vmem:[%s2384_s1] sm:$0xff]  ;;  %v18_v1 = vld [vmem:[%s2384_s1 + $0x8] sm:$0xff]  ;;  %v19_v2 = vld [vmem:[%s2384_s1 + $0x10] sm:$0xff]  ;;  %2091 = vmatprep.subr.bf16.mxu0 %v2205_v3  ;;  %2109 = vmatprep.subr.bf16.mxu1 %v2205_v3 }
   0x2   :  { %v28_v4 = vand.u32 4294901760, %v17_v0  ;;  %v31_v5 = vand.u32 4294901760, %v18_v1  ;;  %v20_v6 = vld [vmem:[%s2384_s1 + $0x18] sm:$0xff]  ;;  %v490_v7 = vand.u32 4294901760, %v19_v2  ;;  %v15_v8 = vld [vmem:[%s2383_s0] sm:$0xff]  ;;  %1951 = vmatprep.mubr.msk.f32.mxu0 %vm2206_vm1, %v2207_v10  ;;  %1993 = vmatprep.mubr.msk.f32.mxu1 %vm2206_vm1, %v2207_v10  ;;  %v16_v12 = vld [vmem:[%s2383_s0 + $0x8] sm:$0xff] }
   0x3   :  { %v493_v9 = vand.u32 4294901760, %v20_v6  ;;  %v25_v11 = vsel %vm23_vm0, %v15_v8, 0 }
   0x4   :  { %8 = vsyncpa [#allocation3], 0  ;;  %v2256_v13 = vpack.c.bf16 %v31_v5, %v28_v4  ;;  %v106_v14 = vsub.f32 %v17_v0, %v28_v4  ;;  %v113_v15 = vsub.f32 %v18_v1, %v31_v5  ;;  %v568_v16 = vsub.f32 %v19_v2, %v490_v7  ;;  %v21_v54 = vld [vmem:[%s2385_s2] sm:$0xff]  ;;  %v22_v56 = vld [vmem:[%s2385_s2 + $0x8] sm:$0xff]  ;;  %s2208_s2 = smov [#allocation2]  }
   0x5   :  { %v2258_v17 = vpack.c.bf16 %v493_v9, %v490_v7  ;;  %v575_v18 = vsub.f32 %v20_v6, %v493_v9  ;;  %v2260_v19 = vand.u32 4294901760, %v25_v11  ;;  %v487_v20 = vsel %vm23_vm0, %v16_v12, 0  ;;  %s1876_s26 = sshll.u32 %s2208_s2, 4  ;;  %s1877_s26 = int_to_ptr.vmem [resolvable:$true] %s1876_s26 }
   0x6   :  { %2093 = vmatpush3.bf16.msra.mxu0 %v2256_v13  ;;  %v2264_v21 = vand.u32 4294901760, %v487_v20  ;;  %v107_v22 = vand.u32 4294901760, %v106_v14  ;;  %v114_v23 = vand.u32 4294901760, %v113_v15  ;;  %v569_v24 = vand.u32 4294901760, %v568_v16  ;;  %s2181_s27 = scalar_lea.vmem %s1877_s26, 256  ;;  %p2186_p1 = scmp.lt.s32.totalorder %s1877_s26, %s1877_s26 }
   0x7   :  { %2111 = vmatpush3.bf16.msra.mxu1 %v2258_v17  ;;  %v95_v25 = vsub.f32 %v25_v11, %v2260_v19  ;;  %2094 = vmatprep.subr.bf16.mxu0 %v2205_v3  ;;  %v576_v26 = vand.u32 4294901760, %v575_v18  ;;  %v2098_v44 = vpack.c.bf16 %v113_v15, %v106_v14  ;;  %v2116_v45 = vpack.c.bf16 %v575_v18, %v568_v16  ;;  %p2182_p0 = scmp.ne.s32.totalorder %s1877_s26, %s2181_s27  ;;  %p2187_p2 = scmp.lt.s32.totalorder %s2181_s27, %s2181_s27 }
   0x8   :  { %v557_v27 = vsub.f32 %v487_v20, %v2264_v21  ;;  %v108_v28 = vsub.f32 %v106_v14, %v107_v22  ;;  %v115_v29 = vsub.f32 %v113_v15, %v114_v23  ;;  %2112 = vmatprep.subr.bf16.mxu1 %v2205_v3  ;;  %v570_v30 = vsub.f32 %v568_v16, %v569_v24 }
   0x9   :  { %v96_v31 = vand.u32 4294901760, %v95_v25  ;;  %v577_v32 = vsub.f32 %v575_v18, %v576_v26  ;;  %v2104_v46 = vpack.c.bf16 %v114_v23, %v107_v22  ;;  %v2122_v47 = vpack.c.bf16 %v576_v26, %v569_v24  ;;  %p2188_p3 = por %p2187_p2, %p2186_p1 }
   0xa   :  { %v558_v33 = vand.u32 4294901760, %v557_v27  ;;  %v109_v34 = vand.u32 4294901760, %v108_v28  ;;  %v116_v35 = vand.u32 4294901760, %v115_v29  ;;  %v571_v36 = vand.u32 4294901760, %v570_v30 }
   0xb   :  { %v97_v37 = vsub.f32 %v95_v25, %v96_v31  ;;  %v578_v38 = vand.u32 4294901760, %v577_v32  ;;  %vm948_vm2 = vcmask 64512   ;;  %v2320_v55 = vand.u32 4294901760, %v21_v54  ;;  %p2189_p4 = pnand %p2188_p3, %p2182_p0 }
   0xc   :  { %v559_v39 = vsub.f32 %v557_v27, %v558_v33  ;;  %v2095_v40 = vpack.c.bf16 %v116_v35, %v109_v34  ;;  %v2327_v57 = vand.u32 4294901760, %v22_v56 }
   0xd   :  { %v98_v41 = vand.u32 4294901760, %v97_v37  ;;  %v2113_v42 = vpack.c.bf16 %v578_v38, %v571_v36  ;;  %v1048_v0 = vsub.f32 %v21_v54, %v2320_v55 }
   0xe   :  { %v560_v43 = vand.u32 4294901760, %v559_v39  ;;  %v1497_v4 = vsub.f32 %v22_v56, %v2327_v57 }
   0xf   :  { %1952 = vmatmul.mubr.f32.vlgmr.msra.gmra.mrb[0].mxu0 %v98_v41  ;;  %v1049_v5 = vand.u32 4294901760, %v1048_v0 }
  0x10   :  { %1994 = vmatmul.mubr.f32.vlgmr.msra.gmra.mrb[0].mxu1 %v560_v43  ;;  %2096 = vmatpush3.bf16.msra.mxu0 %v2095_v40 }
  0x11   :  { %2114 = vmatpush3.bf16.msra.mxu1 %v2113_v42  ;;  %1958 = vmatprep.mubr.msk.f32.mxu0 %vm2206_vm1, %v2207_v10  ;;  %v1050_v12 = vsub.f32 %v1048_v0, %v1049_v5 }
  0x12   :  { %2000 = vmatprep.mubr.msk.f32.mxu1 %vm2206_vm1, %v2207_v10  ;;  %2097 = vmatprep.subr.bf16.mxu0 %v2205_v3 }
  0x13   :  { %2115 = vmatprep.subr.bf16.mxu1 %v2205_v3  ;;  %v1051_v18 = vand.u32 4294901760, %v1050_v12 }
  0x17   :  { %1959 = vmatmul.mubr.f32.vlgmr.msra.gmra.mrb[0].mxu0 %v2260_v19 }
  0x18   :  { %2001 = vmatmul.mubr.f32.vlgmr.msra.gmra.mrb[0].mxu1 %v2264_v21  ;;  %2099 = vmatpush3.bf16.msra.mxu0 %v2098_v44 }
  0x19   :  { %2117 = vmatpush3.bf16.msra.mxu1 %v2116_v45  ;;  %1965 = vmatprep.mubr.msk.f32.mxu0 %vm2206_vm1, %v2207_v10 }
  0x1a   :  { %2007 = vmatprep.mubr.msk.f32.mxu1 %vm2206_vm1, %v2207_v10  ;;  %2100 = vmatprep.subr.bf16.mxu0 %v2205_v3 }
  0x1b   :  { %2118 = vmatprep.subr.bf16.mxu1 %v2205_v3 }
  0x1f   :  { %1966 = vmatmul.mubr.f32.vlgmr.msra.gmra.mrb[0].mxu0 %v95_v25 }
  0x20   :  { %2008 = vmatmul.mubr.f32.vlgmr.msra.gmra.mrb[0].mxu1 %v557_v27  ;;  %2102 = vmatpush3.bf16.msra.mxu0 %v2256_v13 }
  0x21   :  { %2120 = vmatpush3.bf16.msra.mxu1 %v2258_v17  ;;  %1972 = vmatprep.mubr.msk.f32.mxu0 %vm2206_vm1, %v2207_v10 }
  0x22   :  { %2014 = vmatprep.mubr.msk.f32.mxu1 %vm2206_vm1, %v2207_v10  ;;  %2103 = vmatprep.subr.bf16.mxu0 %v2205_v3 }
  0x23   :  { %2121 = vmatprep.subr.bf16.mxu1 %v2205_v3 }
  0x27   :  { %1973 = vmatmul.mubr.f32.vlgmr.msra.gmra.mrb[0].mxu0 %v96_v31 }
  0x28   :  { %2015 = vmatmul.mubr.f32.vlgmr.msra.gmra.mrb[0].mxu1 %v558_v33  ;;  %2105 = vmatpush3.bf16.msra.mxu0 %v2104_v46 }
  0x29   :  { %2123 = vmatpush3.bf16.msra.mxu1 %v2122_v47  ;;  %1979 = vmatprep.mubr.msk.f32.mxu0 %vm2206_vm1, %v2207_v10 }
  0x2a   :  { %2021 = vmatprep.mubr.msk.f32.mxu1 %vm2206_vm1, %v2207_v10  ;;  %2106 = vmatprep.subr.bf16.mxu0 %v2205_v3 }
  0x2b   :  { %2124 = vmatprep.subr.bf16.mxu1 %v2205_v3 }
  0x2f   :  { %1980 = vmatmul.mubr.f32.vlgmr.msra.gmra.mrb[0].mxu0 %v2260_v19 }
  0x30   :  { %2022 = vmatmul.mubr.f32.vlgmr.msra.gmra.mrb[0].mxu1 %v2264_v21  ;;  %2108 = vmatpush3.bf16.msra.mxu0 %v2256_v13  ;;  %v1498_v13 = vand.u32 4294901760, %v1497_v4 }
  0x31   :  { %2126 = vmatpush3.bf16.msra.mxu1 %v2258_v17  ;;  %1986 = vmatprep.mubr.msk.f32.mxu0 %vm2206_vm1, %v2207_v10 }
  0x32   :  { %2028 = vmatprep.mubr.msk.f32.mxu1 %vm2206_vm1, %v2207_v10  ;;  %2031 = vmatprep.subr.mxu0 %v2207_v10 }
  0x33   :  { %2061 = vmatprep.subr.mxu1 %v2207_v10 }
  0x37   :  { %1987 = vmatmul.mubr.f32.vlgmr.msra.gmra.mrb[0].mxu0 %v2260_v19  ;;  %v1499_v19 = vsub.f32 %v1497_v4, %v1498_v13 }
  0x38   :  { %2029 = vmatmul.mubr.f32.vlgmr.msra.gmra.mrb[0].mxu1 %v2264_v21  ;;  %2033 = vmatprep.mubr.msk.f32.mxu0 %vm2206_vm1, %v2207_v10 }
  0x39   :  { %2063 = vmatprep.mubr.msk.f32.mxu1 %vm2206_vm1, %v2207_v10  ;;  %2032 = vmatpush3.msra.mxu0 %v2320_v55  ;;  %v1500_v23 = vand.u32 4294901760, %v1499_v19 }
  0x3a   :  { %2036 = vmatprep.subr.mxu0 %v2207_v10  ;;  %2062 = vmatpush3.msra.mxu1 %v2327_v57 }
  0x3b   :  { %2066 = vmatprep.subr.mxu1 %v2207_v10 }
 0x10a   :  { %v482_v48 = vpop.f32.mrb[0].mxu0 }
 0x10b   :  { %v944_v49 = vpop.f32.mrb[0].mxu1  ;;  %v1988_v50 = vpop.f32.mrb[1].mxu0  ;;  %v949_v51 = vsel %vm948_vm2, %v482_v48, -inf }
 0x10c   :  { %v2030_v52 = vpop.f32.mrb[1].mxu1  ;;  %950 = vmax.xlane.f32.xlu0 %v949_v51  ;;  %v952_v53 = vsel %vm948_vm2, %v944_v49, -inf }
 0x110   :  { %953 = vmax.xlane.f32.xlu0 %v952_v53 }
 0x199   :  { %v951_v58 = vpop.xlane.xlu0 %950 }
 0x19a   :  { %v955_v59 = vsub.f32 %v482_v48, %v951_v58 }
 0x19c   :  { %v957_v60 = vmul.f32 1.442695, %v955_v59 }
 0x19d   :  { %v954_v61 = vpop.xlane.xlu0 %953 }
 0x19e   :  { %2173 = vpow2.f32 %v957_v60  ;;  %v956_v62 = vsub.f32 %v944_v49, %v954_v61 }
 0x1a0   :  { %v959_v63 = vmul.f32 1.442695, %v956_v62 }
 0x1a2   :  { %2175 = vpow2.f32 %v959_v63 }
 0x1a8   :  { %v2174_v1 = vpop.eup %2173 }
 0x1a9   :  { %v968_v2 = vsel %vm948_vm2, %v2174_v1, 0  ;;  %v961_v3 = vsel %vm948_vm2, %v2174_v1, 0.0 }
 0x1aa   :  { %v1036_v6 = vand.u32 4294901760, %v968_v2  ;;  %962 = vadd.xlane.f32.xlu1 %v961_v3 }
 0x1ac   :  { %v2176_v7 = vpop.eup %2175  ;;  %v1037_v8 = vsub.f32 %v968_v2, %v1036_v6 }
 0x1ad   :  { %v1417_v9 = vsel %vm948_vm2, %v2176_v7, 0  ;;  %v964_v11 = vsel %vm948_vm2, %v2176_v7, 0.0 }
 0x1ae   :  { %v1485_v14 = vand.u32 4294901760, %v1417_v9  ;;  %965 = vadd.xlane.f32.xlu1 %v964_v11  ;;  %v1038_v15 = vand.u32 4294901760, %v1037_v8 }
 0x1b0   :  { %v1039_v16 = vsub.f32 %v1037_v8, %v1038_v15  ;;  %v1486_v17 = vsub.f32 %v1417_v9, %v1485_v14 }
 0x1b2   :  { %v1040_v20 = vand.u32 4294901760, %v1039_v16  ;;  %v1487_v21 = vand.u32 4294901760, %v1486_v17 }
 0x1b4   :  { %2034 = vmatmul.mubr.f32.vlgmr.msra.gmra.mrb[2].mxu0 %v1040_v20  ;;  %v1488_v22 = vsub.f32 %v1486_v17, %v1487_v21 }
 0x1b5   :  { %2037 = vmatpush3.msra.mxu0 %v1051_v18  ;;  %2038 = vmatprep.mubr.msk.f32.mxu0 %vm2206_vm1, %v2207_v10 }
 0x1b6   :  { %v1489_v24 = vand.u32 4294901760, %v1488_v22  ;;  %2041 = vmatprep.subr.mxu0 %v2207_v10 }
 0x1b8   :  { %2064 = vmatmul.mubr.f32.vlgmr.msra.gmra.mrb[2].mxu1 %v1489_v24 }
 0x1b9   :  { %2067 = vmatpush3.msra.mxu1 %v1500_v23  ;;  %2068 = vmatprep.mubr.msk.f32.mxu1 %vm2206_vm1, %v2207_v10 }
 0x1ba   :  { %2071 = vmatprep.subr.mxu1 %v2207_v10 }
 0x1bc   :  { %2039 = vmatmul.mubr.f32.vlgmr.msra.gmra.mrb[2].mxu0 %v1036_v6 }
 0x1bd   :  { %2042 = vmatpush3.msra.mxu0 %v1048_v0  ;;  %2043 = vmatprep.mubr.msk.f32.mxu0 %vm2206_vm1, %v2207_v10 }
 0x1be   :  { %2046 = vmatprep.subr.mxu0 %v2207_v10 }
 0x1c0   :  { %2069 = vmatmul.mubr.f32.vlgmr.msra.gmra.mrb[2].mxu1 %v1485_v14 }
 0x1c1   :  { %2072 = vmatpush3.msra.mxu1 %v1497_v4  ;;  %2073 = vmatprep.mubr.msk.f32.mxu1 %vm2206_vm1, %v2207_v10 }
 0x1c2   :  { %2076 = vmatprep.subr.mxu1 %v2207_v10 }
 0x1c4   :  { %2044 = vmatmul.mubr.f32.vlgmr.msra.gmra.mrb[2].mxu0 %v1037_v8 }
 0x1c5   :  { %2047 = vmatpush3.msra.mxu0 %v2320_v55  ;;  %2048 = vmatprep.mubr.msk.f32.mxu0 %vm2206_vm1, %v2207_v10 }
 0x1c6   :  { %2051 = vmatprep.subr.mxu0 %v2207_v10 }
 0x1c8   :  { %2074 = vmatmul.mubr.f32.vlgmr.msra.gmra.mrb[2].mxu1 %v1486_v17 }
 0x1c9   :  { %2077 = vmatpush3.msra.mxu1 %v2327_v57  ;;  %2078 = vmatprep.mubr.msk.f32.mxu1 %vm2206_vm1, %v2207_v10 }
 0x1ca   :  { %2081 = vmatprep.subr.mxu1 %v2207_v10 }
 0x1cc   :  { %2049 = vmatmul.mubr.f32.vlgmr.msra.gmra.mrb[2].mxu0 %v1038_v15 }
 0x1cd   :  { %2052 = vmatpush3.msra.mxu0 %v1049_v5  ;;  %2053 = vmatprep.mubr.msk.f32.mxu0 %vm2206_vm1, %v2207_v10 }
 0x1ce   :  { %2056 = vmatprep.subr.mxu0 %v2207_v10 }
 0x1d0   :  { %2079 = vmatmul.mubr.f32.vlgmr.msra.gmra.mrb[2].mxu1 %v1487_v21 }
 0x1d1   :  { %2082 = vmatpush3.msra.mxu1 %v1498_v13  ;;  %2083 = vmatprep.mubr.msk.f32.mxu1 %vm2206_vm1, %v2207_v10 }
 0x1d2   :  { %2086 = vmatprep.subr.mxu1 %v2207_v10 }
 0x1d4   :  { %2054 = vmatmul.mubr.f32.vlgmr.msra.gmra.mrb[2].mxu0 %v1036_v6 }
 0x1d5   :  { %2057 = vmatpush3.msra.mxu0 %v2320_v55  ;;  %2058 = vmatprep.mubr.msk.f32.mxu0 %vm2206_vm1, %v2207_v10 }
 0x1d8   :  { %2084 = vmatmul.mubr.f32.vlgmr.msra.gmra.mrb[2].mxu1 %v1485_v14 }
 0x1d9   :  { %2087 = vmatpush3.msra.mxu1 %v2327_v57  ;;  %2088 = vmatprep.mubr.msk.f32.mxu1 %vm2206_vm1, %v2207_v10 }
 0x1dc   :  { %2059 = vmatmul.mubr.f32.vlgmr.msra.gmra.mrb[2].mxu0 %v1036_v6 }
 0x1e0   :  { %2089 = vmatmul.mubr.f32.vlgmr.msra.gmra.mrb[2].mxu1 %v1485_v14 }
 0x237   :  { %v963_v25 = vpop.xlane.xlu1 %962 }
 0x238   :  { %2177 = vrcp.f32 %v963_v25 }
 0x23b   :  { %v966_v26 = vpop.xlane.xlu1 %965 }
 0x23c   :  { %2179 = vrcp.f32 %v966_v26 }
 0x242   :  { %v2178_v27 = vpop.eup %2177 }
 0x246   :  { %v2180_v31 = vpop.eup %2179 }
 0x2af   :  { %v1412_v28 = vpop.f32.mrb[2].mxu0 }
 0x2b0   :  { %v1866_v29 = vmul.f32 %v2178_v27, %v1412_v28  ;;  %v2060_v30 = vpop.f32.mrb[3].mxu0 }
 0x2b2   :  { %1869 = vst.msk [vmem:[#allocation2] sm:$0xff] %vm23_vm0, %v1866_v29 }
 0x2b3   :  { %v1861_v32 = vpop.f32.mrb[2].mxu1 }
 0x2b4   :  { %v1868_v33 = vmul.f32 %v2180_v31, %v1861_v32  ;;  %v2090_v34 = vpop.f32.mrb[3].mxu1 }
 0x2b6   :  { %1870 = vst.msk [vmem:[#allocation2 + $0x8] sm:$0xff] %vm23_vm0, %v1868_v33 }
 0x2b7   :  { %2192 = shalt.err (!%p2189_p4)
}
 0x2b8   :  { %s2193_s30 = scalar_lea.hbm %s2386_s3, 256 }
 0x2b9   :  { %p2194_p5 = scmp.ne.s32.totalorder %s2386_s3, %s2193_s30  ;;  %p2197_p6 = scmp.lt.u32.totalorder %s2193_s30, %s2386_s3 }
 0x2bb   :  { %p2199_p7 = pnand %p2197_p6, %p2194_p5 }
 0x2bd   :  { %2202 = shalt.err (!%p2199_p7)
}
 0x2be   :  { %s2209_s8 = smov 128   ;;  %s2210_s9 = smov 8  }
 0x2bf   :  { %1882 = dma.vmem_to_hbm [thread:$0]  %s1877_s26, 256, %s2386_s3, [#allocation3], %s2209_s8, %s2209_s8, %s2210_s9  }
 0x2c0   :  { %2203 = dma.done.wait [#allocation3], 256  }
 0x2c1   :  { %2204 = vsyncadd [#allocation3], 4294967040 }
 0x2c2   :  { %1886 = vsyncpa [#allocation3], 1 }

</bundles_post_ra>
